<compile_context>
chip_gen: v7x
topology: tpu7x:2x2x1
jax: 0.10.0
libtpu: 0.0.40
codegen_flags: <defaults>
</compile_context>

<pallas_src>
import functools

import jax
import jax.numpy as jnp
from jax.experimental import pallas as pl
from jax.experimental.pallas import tpu as pltpu


def _gap_kernel_single(x_ref, o_ref, *, inv_hw):
    # Whole spatial extent fits in one block: reduce lanes and write directly.
    x = x_ref[...].astype(jnp.float32)
    o_ref[...] = (jnp.sum(x, axis=-1, keepdims=True) * inv_hw).astype(o_ref.dtype)


def _gap_kernel_tiled(x_ref, o_ref, acc_ref, *, inv_hw, hw, tk, has_tail):
    # x_ref:   (TR, TK) input tile in VMEM
    # o_ref:   (TR, 1)  output tile (same block for every k step -> resident)
    # acc_ref: (TR, 1)  f32 scratch accumulator, persists across the k axis
    k = pl.program_id(1)

    @pl.when(k == 0)
    def _():
        acc_ref[...] = jnp.zeros_like(acc_ref)

    x = x_ref[...].astype(jnp.float32)
    if has_tail:
        # Last k block extends past hw; the out-of-bounds lanes of the VMEM
        # buffer are garbage — mask them to zero (no host-side jnp.pad copy).
        lane = jax.lax.broadcasted_iota(jnp.int32, x.shape, dimension=1)
        x = jnp.where(k * tk + lane < hw, x, 0.0)

    # Lane-axis reduce (VPU/XLU); kernel is HBM-bound so this hides under DMA.
    acc_ref[...] += jnp.sum(x, axis=-1, keepdims=True)

    @pl.when(k == pl.num_programs(1) - 1)
    def _():
        o_ref[...] = (acc_ref[...] * inv_hw).astype(o_ref.dtype)


def global_avg_pool2d(x, *, tk_cap=4096, block_budget_bytes=16 << 20, tr_cap=8192):
    """x: (N, C, H, W) -> (N, C, 1, 1), mean over spatial dims."""
    N, C, H, W = x.shape
    rows = N * C
    hw = H * W
    inv_hw = 1.0 / float(hw)
    itemsize = jnp.dtype(x.dtype).itemsize

    x2 = x.reshape(rows, hw)

    # ---- reduction (lane) tile ------------------------------------------
    if hw <= tk_cap:
        tk = hw          # block dim == full array dim is always legal
        nk = 1
    else:
        tk = tk_cap      # multiple of 128
        nk = pl.cdiv(hw, tk)
    has_tail = (hw % tk) != 0

    # ---- row tile, from a VMEM byte budget -------------------------------
    # Per row of a tile we pay: double-buffered input, double-buffered
    # lane-padded (tr,1) output (128 lanes), and (nk>1 only) f32 scratch.
    per_row_bytes = 2 * tk * itemsize
    per_row_bytes += 2 * 128 * itemsize
    if nk > 1:
        per_row_bytes += 128 * 4
    tr = max(8, (block_budget_bytes // per_row_bytes) // 8 * 8)
    tr = min(tr, tr_cap)
    if tr >= rows:
        tr = rows
        # Megacore (v7x): make sure the "parallel" row axis has >= 2 steps so
        # both TensorCores get work; skip for trivially small tensors where
        # the extra grid step would not pay for itself on single-TC chips.
        if rows >= 16 and rows * hw * itemsize >= (128 << 10):
            tr = ((pl.cdiv(rows, 2) + 7) // 8) * 8
    nr = pl.cdiv(rows, tr)

    # Generous but safe scoped-VMEM limit (<= v7x's 64 MiB physical per TC).
    vmem_limit = 40 << 20

    cost = pl.CostEstimate(
        flops=rows * hw,
        transcendentals=0,
        bytes_accessed=rows * hw * itemsize + rows * itemsize,
    )

    if nk == 1:
        out = pl.pallas_call(
            functools.partial(_gap_kernel_single, inv_hw=inv_hw),
            out_shape=jax.ShapeDtypeStruct((rows, 1), x.dtype),
            grid_spec=pltpu.PrefetchScalarGridSpec(
                num_scalar_prefetch=0,
                grid=(nr,),
                in_specs=[pl.BlockSpec((tr, tk), lambda i: (i, 0))],
                out_specs=pl.BlockSpec((tr, 1), lambda i: (i, 0)),
            ),
            compiler_params=pltpu.CompilerParams(
                dimension_semantics=("parallel",),
                vmem_limit_bytes=vmem_limit,
            ),
            cost_estimate=cost,
        )(x2)
    else:
        out = pl.pallas_call(
            functools.partial(
                _gap_kernel_tiled, inv_hw=inv_hw, hw=hw, tk=tk, has_tail=has_tail
            ),
            out_shape=jax.ShapeDtypeStruct((rows, 1), x.dtype),
            grid_spec=pltpu.PrefetchScalarGridSpec(
                num_scalar_prefetch=0,
                grid=(nr, nk),  # reduction axis last
                in_specs=[pl.BlockSpec((tr, tk), lambda i, k: (i, k))],
                out_specs=pl.BlockSpec((tr, 1), lambda i, k: (i, 0)),
                scratch_shapes=[pltpu.VMEM((tr, 1), jnp.float32)],
            ),
            compiler_params=pltpu.CompilerParams(
                dimension_semantics=("parallel", "arbitrary"),
                vmem_limit_bytes=vmem_limit,
            ),
            cost_estimate=cost,
        )(x2)

    return out.reshape(N, C, 1, 1)


if __name__ == "__main__":
    key = jax.random.PRNGKey(0)

    # GlobalAvgPool2d has no parameters; deterministic small inputs.
    x = jax.random.normal(key, (2, 4, 16, 16), dtype=jnp.float32)
    y = jax.block_until_ready(global_avg_pool2d(x))
    ref = jnp.mean(x, axis=(2, 3), keepdims=True)
    assert y.shape == (2, 4, 1, 1)
    assert jnp.allclose(y, ref, atol=1e-5, rtol=1e-5)

    # GoogleNet-style small-spatial case (7x7) — single-block fast path.
    x_g = jax.random.normal(key, (2, 32, 7, 7), dtype=jnp.float32)
    y_g = jax.block_until_ready(global_avg_pool2d(x_g))
    ref_g = jnp.mean(x_g, axis=(2, 3), keepdims=True)
    assert y_g.shape == (2, 32, 1, 1)
    assert jnp.allclose(y_g, ref_g, atol=1e-5, rtol=1e-5)

    # Large-spatial case: tiled reduction with in-kernel tail masking (no pad).
    x_big = jax.random.normal(key, (2, 4, 72, 72), dtype=jnp.float32)
    y_big = jax.block_until_ready(global_avg_pool2d(x_big))
    ref_big = jnp.mean(x_big, axis=(2, 3), keepdims=True)
    assert jnp.allclose(y_big, ref_big, atol=1e-4, rtol=1e-5)

    print("KERNEL_OK")
</pallas_src>

<mosaic_0001>
module attributes {stable_mosaic.version = 11 : i64} {
  func.func @_gap_kernel_single(%arg0: i32, %arg1: memref<8x256xf32, #tpu.memory_space<vmem>>, %arg2: memref<8x1xf32, #tpu.memory_space<vmem>>) attributes {dimension_semantics = [#tpu.dimension_semantics<parallel>], iteration_bounds = array<i64: 1>, scalar_prefetch = 0 : i64, scratch_operands = 0 : i64, tpu.core_type = #tpu.core_type<tc>, window_params = [{transform_indices = @transform_0, window_bounds = array<i64: 8, 256>}, {transform_indices = @transform_1, window_bounds = array<i64: 8, 1>}]} {
    %c0 = arith.constant 0 : index
    %c0_0 = arith.constant 0 : index
    %0 = vector.load %arg1[%c0, %c0_0] : memref<8x256xf32, #tpu.memory_space<vmem>>, vector<8x256xf32>
    %cst = arith.constant dense<0.000000e+00> : vector<8xf32>
    %1 = vector.multi_reduction <add>, %0, %cst [1] : vector<8x256xf32> to vector<8xf32>
    %2 = vector.shape_cast %1 : vector<8xf32> to vector<8x1xf32>
    %cst_1 = arith.constant 3.906250e-03 : f32
    %3 = vector.broadcast %cst_1 : f32 to vector<8x1xf32>
    %4 = arith.mulf %2, %3 : vector<8x1xf32>
    %c0_2 = arith.constant 0 : index
    %c0_3 = arith.constant 0 : index
    %5 = vector.load %arg2[%c0_2, %c0_3] : memref<8x1xf32, #tpu.memory_space<vmem>>, vector<8x1xf32>
    tpu.vector_store %arg2[%c0_2, %c0_3], %4 {strides = array<i32>} : memref<8x1xf32, #tpu.memory_space<vmem>>, vector<8x1xf32>,
    return
  }
  func.func @transform_0(%arg0: i32) -> (i32, i32) {
    %c0_i32 = arith.constant 0 : i32
    %c0_i32_0 = arith.constant 0 : i32
    return %arg0, %c0_i32 : i32, i32
  }
  func.func @transform_1(%arg0: i32) -> (i32, i32) {
    %c0_i32 = arith.constant 0 : i32
    %c0_i32_0 = arith.constant 0 : i32
    return %arg0, %c0_i32 : i32, i32
  }
}

</mosaic_0001>

<bundles_post_ra>
// kernel: tpu_custom_call.1
= control target key start
LH: loop header
LB: loop body
LE: loop exit
PB: predicated region body
PF: predicated region fallthrough
CT: control target
= control target key end

     0   :  { %6 = vsyncpa [#allocation3], 0  ;;  %s58_s6 = smov [#allocation2]   ;;  %s84_s0 = inlined_call_operand.hbm [shape: f32[8,256], index: 0, kind: input, shape index: {}]   ;;  %s85_s1 = inlined_call_operand.vmem [shape: f32[8,1], index: 1, kind: output, shape index: {}]  }
   0x1   :  { %s13_s7 = sshll.u32 %s58_s6, 4  ;;  %s34_s10 = scalar_lea.hbm %s84_s0, 256  ;;  %s14_s7 = int_to_ptr.vmem [resolvable:$true] %s13_s7 }
   0x2   :  { %p35_p0 = scmp.ne.s32.totalorder %s84_s0, %s34_s10  ;;  %p38_p1 = scmp.lt.u32.totalorder %s34_s10, %s84_s0 }
   0x4   :  { %p40_p2 = pnand %p38_p1, %p35_p0 }
   0x6   :  { %43 = shalt.err (!%p40_p2)
}
   0x7   :  { %s44_s15 = scalar_lea.vmem %s14_s7, 256  ;;  %p49_p4 = scmp.lt.s32.totalorder %s14_s7, %s14_s7 }
   0x8   :  { %p45_p3 = scmp.ne.s32.totalorder %s14_s7, %s44_s15  ;;  %p50_p5 = scmp.lt.s32.totalorder %s44_s15, %s44_s15 }
   0xa   :  { %p51_p6 = por %p50_p5, %p49_p4 }
   0xc   :  { %p52_p7 = pnand %p51_p6, %p45_p3 }
   0xe   :  { %55 = shalt.err (!%p52_p7)
}
   0xf   :  { %16 = dma.hbm_to_vmem [thread:$0]  %s84_s0, 256, %s14_s7, [#allocation3]  }
  0x10   :  { %56 = dma.done.wait [#allocation3], 256  }
  0x11   :  { %57 = vsyncadd [#allocation3], 4294967040  ;;  %v20_v0 = vld [vmem:[#allocation2] sm:$0xff]  ;;  %v21_v1 = vld [vmem:[#allocation2 + $0x8] sm:$0xff]  ;;  %vm26_vm0 = vcmask 7168  }
  0x12   :  { %v22_v2 = vadd.f32 %v21_v1, %v20_v0 }
  0x14   :  { %23 = vadd.xlane.f32.xlu0 %v22_v2 }
  0xa1   :  { %v24_v3 = vpop.xlane.xlu0 %23 }
  0xa2   :  { %v25_v4 = vmul.f32 0.00390625, %v24_v3 }
  0xa4   :  { %27 = vst.msk [vmem:[%s85_s1] sm:$0xff] %vm26_vm0, %v25_v4 }
  0xa5   :  { %32 = vsyncpa [#allocation3], 1 }

</bundles_post_ra>
